<compile_context>
chip_gen: v6e
topology: v6e:2x2x1
jax: 0.10.0
libtpu: 0.0.40
codegen_flags: <defaults>
</compile_context>

<pallas_src>
import jax
import jax.numpy as jnp
from jax.experimental import pallas as pl
from jax.experimental.pallas import tpu as pltpu


def _round_up(x, m):
    return ((x + m - 1) // m) * m


def actor_mlp_kernel(x_ref, w1_ref, b1_ref, w2_ref, b2_ref, w3_ref, b3_ref, mu_ref):
    """Fused 3-layer MLP: relu(relu(x@W1+b1)@W2+b2)@W3+b3 with f32 accumulation."""
    x = x_ref[...]                                                        # (TB, D) bf16
    h1 = jnp.dot(x, w1_ref[...], preferred_element_type=jnp.float32) + b1_ref[...]
    h1 = jnp.maximum(h1, 0.0)                                             # ReLU in f32
    h2 = jnp.dot(h1.astype(w2_ref.dtype), w2_ref[...],
                 preferred_element_type=jnp.float32) + b2_ref[...]
    h2 = jnp.maximum(h2, 0.0)                                             # ReLU in f32
    mu = jnp.dot(h2.astype(w3_ref.dtype), w3_ref[...],
                 preferred_element_type=jnp.float32) + b3_ref[...]
    mu_ref[...] = mu.astype(mu_ref.dtype)                                 # (TB, O)


def actor_g_forward(inputs, params, num_agents, *, block_b=1024, out_dtype=jnp.float32):
    """ActorG forward. inputs: (B, num_inputs). Returns mu: (B, num_outputs)."""
    w1, b1, w2, b2, w3, b3 = params
    B, D = inputs.shape
    H = w1.shape[1]
    O = w3.shape[1]
    assert D % num_agents == 0          # inputs.view(B, num_agents, -1) is well defined
    assert w1.shape[0] == D

    # Batch tile: big enough to hide per-step overhead / amortize the lane-sparse output
    # store, small enough that 2x double-buffered (TB, D) blocks stay far under scoped VMEM.
    tb = min(block_b, _round_up(B, 8))
    grid = (pl.cdiv(B, tb),)

    x_spec = pl.BlockSpec((tb, D), lambda i: (i, 0))
    out_spec = pl.BlockSpec((tb, O), lambda i: (i, 0))

    def resident(arr):
        # Constant block index -> fetched once, stays VMEM-resident across grid steps.
        return pl.BlockSpec(arr.shape, lambda i: (0, 0))

    flops = 2 * B * (D * H + H * H + H * O)
    bytes_accessed = (
        inputs.size * inputs.dtype.itemsize
        + sum(int(p.size) * p.dtype.itemsize for p in params)
        + B * O * jnp.dtype(out_dtype).itemsize
    )

    return pl.pallas_call(
        actor_mlp_kernel,
        out_shape=jax.ShapeDtypeStruct((B, O), out_dtype),
        grid=grid,
        in_specs=[x_spec, resident(w1), resident(b1), resident(w2),
                  resident(b2), resident(w3), resident(b3)],
        out_specs=out_spec,
        compiler_params=pltpu.CompilerParams(
            dimension_semantics=("parallel",),          # shard batch tiles across TCs (v7x)
        ),
        cost_estimate=pl.CostEstimate(
            flops=flops, transcendentals=0, bytes_accessed=bytes_accessed),
    )(inputs, w1, b1, w2, b2, w3, b3)


def init_params(key, in_dim, hidden_size, num_outputs, compute_dtype=jnp.bfloat16):
    """torch.nn.Linear default init U(-1/sqrt(fan_in), 1/sqrt(fan_in)); mu layer scaled by 0.1.

    Weights are stored (in_features, out_features) in `compute_dtype` (MXU operands);
    biases are kept f32 so the bias-add/ReLU path stays in f32.
    """
    ks = jax.random.split(key, 6)

    def lin(kw, kb, fan_in, fan_out, scale=1.0):
        bound = 1.0 / float(fan_in) ** 0.5
        w = jax.random.uniform(kw, (fan_in, fan_out), jnp.float32, -bound, bound) * scale
        b = jax.random.uniform(kb, (1, fan_out), jnp.float32, -bound, bound) * scale
        return w.astype(compute_dtype), b.astype(jnp.float32)

    w1, b1 = lin(ks[0], ks[1], in_dim, hidden_size)
    w2, b2 = lin(ks[2], ks[3], hidden_size, hidden_size)
    w3, b3 = lin(ks[4], ks[5], hidden_size, num_outputs, scale=0.1)   # mu.weight/bias.mul_(0.1)
    return (w1, b1, w2, b2, w3, b3)


if __name__ == "__main__":
    # Small shapes consistent with the module: 4 agents, per-agent obs=6 -> num_inputs=24,
    # num_outputs=8 total actions, hidden_size=32.
    batch = 8
    num_agents = 4
    obs_per_agent = 6
    num_inputs = num_agents * obs_per_agent      # 24
    num_outputs = 8
    hidden_size = 32

    key = jax.random.PRNGKey(0)
    k_in, k_par = jax.random.split(key, 2)
    inputs = jax.random.normal(k_in, (batch, num_inputs), jnp.float32).astype(jnp.bfloat16)
    params = init_params(k_par, num_inputs, hidden_size, num_outputs)

    mu = actor_g_forward(inputs, params, num_agents)
    mu = jax.block_until_ready(mu)

    # Pure-JAX reference with identical dtype pattern (bf16 operands, f32 accumulation).
    w1, b1, w2, b2, w3, b3 = params
    ref = jnp.maximum(jnp.dot(inputs, w1, preferred_element_type=jnp.float32) + b1, 0.0)
    ref = jnp.maximum(jnp.dot(ref.astype(w2.dtype), w2,
                              preferred_element_type=jnp.float32) + b2, 0.0)
    ref = jnp.dot(ref.astype(w3.dtype), w3, preferred_element_type=jnp.float32) + b3

    assert mu.shape == (batch, num_outputs)
    assert jnp.allclose(mu, ref, atol=1e-3, rtol=1e-3)
    print("KERNEL_OK")
</pallas_src>

<mosaic_0001>
module attributes {stable_mosaic.version = 11 : i64} {
  func.func @actor_mlp_kernel(%arg0: i32, %arg1: memref<8x24xbf16, #tpu.memory_space<vmem>>, %arg2: memref<24x32xbf16, #tpu.memory_space<vmem>>, %arg3: memref<1x32xf32, #tpu.memory_space<vmem>>, %arg4: memref<32x32xbf16, #tpu.memory_space<vmem>>, %arg5: memref<1x32xf32, #tpu.memory_space<vmem>>, %arg6: memref<32x8xbf16, #tpu.memory_space<vmem>>, %arg7: memref<1x8xf32, #tpu.memory_space<vmem>>, %arg8: memref<8x8xf32, #tpu.memory_space<vmem>>) attributes {dimension_semantics = [#tpu.dimension_semantics<parallel>], iteration_bounds = array<i64: 1>, scalar_prefetch = 0 : i64, scratch_operands = 0 : i64, tpu.core_type = #tpu.core_type<tc>, window_params = [{transform_indices = @transform_0, window_bounds = array<i64: 8, 24>}, {pipeline_mode = #tpu.pipeline_mode<synchronous>, transform_indices = @transform_1, window_bounds = array<i64: 24, 32>}, {pipeline_mode = #tpu.pipeline_mode<synchronous>, transform_indices = @transform_2, window_bounds = array<i64: 1, 32>}, {pipeline_mode = #tpu.pipeline_mode<synchronous>, transform_indices = @transform_3, window_bounds = array<i64: 32, 32>}, {pipeline_mode = #tpu.pipeline_mode<synchronous>, transform_indices = @transform_4, window_bounds = array<i64: 1, 32>}, {pipeline_mode = #tpu.pipeline_mode<synchronous>, transform_indices = @transform_5, window_bounds = array<i64: 32, 8>}, {pipeline_mode = #tpu.pipeline_mode<synchronous>, transform_indices = @transform_6, window_bounds = array<i64: 1, 8>}, {transform_indices = @transform_7, window_bounds = array<i64: 8, 8>}]} {
    %c0 = arith.constant 0 : index
    %c0_0 = arith.constant 0 : index
    %0 = vector.load %arg1[%c0, %c0_0] : memref<8x24xbf16, #tpu.memory_space<vmem>>, vector<8x24xbf16>
    %c0_1 = arith.constant 0 : index
    %c0_2 = arith.constant 0 : index
    %1 = vector.load %arg2[%c0_1, %c0_2] : memref<24x32xbf16, #tpu.memory_space<vmem>>, vector<24x32xbf16>
    %cst = arith.constant dense<0.000000e+00> : vector<8x32xf32>
    %2 = tpu.matmul %0, %1, %cst {dimension_numbers = #tpu.dot_dimension_numbers<[1], [0], [0], [1], [0, 0, 1, 1], [], []>} : vector<8x24xbf16>, vector<24x32xbf16>, vector<8x32xf32> -> vector<8x32xf32>
    %c0_3 = arith.constant 0 : index
    %c0_4 = arith.constant 0 : index
    %3 = vector.load %arg3[%c0_3, %c0_4] : memref<1x32xf32, #tpu.memory_space<vmem>>, vector<1x32xf32>
    %4 = vector.broadcast %3 : vector<1x32xf32> to vector<8x32xf32>
    %5 = arith.addf %2, %4 : vector<8x32xf32>
    %cst_5 = arith.constant 0.000000e+00 : f32
    %6 = vector.broadcast %cst_5 : f32 to vector<8x32xf32>
    %7 = arith.maximumf %5, %6 : vector<8x32xf32>
    %8 = arith.truncf %7 : vector<8x32xf32> to vector<8x32xbf16>
    %c0_6 = arith.constant 0 : index
    %c0_7 = arith.constant 0 : index
    %9 = vector.load %arg4[%c0_6, %c0_7] : memref<32x32xbf16, #tpu.memory_space<vmem>>, vector<32x32xbf16>
    %cst_8 = arith.constant dense<0.000000e+00> : vector<8x32xf32>
    %10 = tpu.matmul %8, %9, %cst_8 {dimension_numbers = #tpu.dot_dimension_numbers<[1], [0], [0], [1], [0, 0, 1, 1], [], []>} : vector<8x32xbf16>, vector<32x32xbf16>, vector<8x32xf32> -> vector<8x32xf32>
    %c0_9 = arith.constant 0 : index
    %c0_10 = arith.constant 0 : index
    %11 = vector.load %arg5[%c0_9, %c0_10] : memref<1x32xf32, #tpu.memory_space<vmem>>, vector<1x32xf32>
    %12 = vector.broadcast %11 : vector<1x32xf32> to vector<8x32xf32>
    %13 = arith.addf %10, %12 : vector<8x32xf32>
    %cst_11 = arith.constant 0.000000e+00 : f32
    %14 = vector.broadcast %cst_11 : f32 to vector<8x32xf32>
    %15 = arith.maximumf %13, %14 : vector<8x32xf32>
    %16 = arith.truncf %15 : vector<8x32xf32> to vector<8x32xbf16>
    %c0_12 = arith.constant 0 : index
    %c0_13 = arith.constant 0 : index
    %17 = vector.load %arg6[%c0_12, %c0_13] : memref<32x8xbf16, #tpu.memory_space<vmem>>, vector<32x8xbf16>
    %cst_14 = arith.constant dense<0.000000e+00> : vector<8x8xf32>
    %18 = tpu.matmul %16, %17, %cst_14 {dimension_numbers = #tpu.dot_dimension_numbers<[1], [0], [0], [1], [0, 0, 1, 1], [], []>} : vector<8x32xbf16>, vector<32x8xbf16>, vector<8x8xf32> -> vector<8x8xf32>
    %c0_15 = arith.constant 0 : index
    %c0_16 = arith.constant 0 : index
    %19 = vector.load %arg7[%c0_15, %c0_16] : memref<1x8xf32, #tpu.memory_space<vmem>>, vector<1x8xf32>
    %20 = vector.broadcast %19 : vector<1x8xf32> to vector<8x8xf32>
    %21 = arith.addf %18, %20 : vector<8x8xf32>
    %c0_17 = arith.constant 0 : index
    %c0_18 = arith.constant 0 : index
    %22 = vector.load %arg8[%c0_17, %c0_18] : memref<8x8xf32, #tpu.memory_space<vmem>>, vector<8x8xf32>
    tpu.vector_store %arg8[%c0_17, %c0_18], %21 {strides = array<i32>} : memref<8x8xf32, #tpu.memory_space<vmem>>, vector<8x8xf32>,
    return
  }
  func.func @transform_0(%arg0: i32) -> (i32, i32) {
    %c0_i32 = arith.constant 0 : i32
    %c0_i32_0 = arith.constant 0 : i32
    return %arg0, %c0_i32 : i32, i32
  }
  func.func @transform_1(%arg0: i32) -> (i32, i32) {
    %c0_i32 = arith.constant 0 : i32
    %c0_i32_0 = arith.constant 0 : i32
    %c0_i32_1 = arith.constant 0 : i32
    return %c0_i32, %c0_i32_0 : i32, i32
  }
  func.func @transform_2(%arg0: i32) -> (i32, i32) {
    %c0_i32 = arith.constant 0 : i32
    %c0_i32_0 = arith.constant 0 : i32
    %c0_i32_1 = arith.constant 0 : i32
    return %c0_i32, %c0_i32_0 : i32, i32
  }
  func.func @transform_3(%arg0: i32) -> (i32, i32) {
    %c0_i32 = arith.constant 0 : i32
    %c0_i32_0 = arith.constant 0 : i32
    %c0_i32_1 = arith.constant 0 : i32
    return %c0_i32, %c0_i32_0 : i32, i32
  }
  func.func @transform_4(%arg0: i32) -> (i32, i32) {
    %c0_i32 = arith.constant 0 : i32
    %c0_i32_0 = arith.constant 0 : i32
    %c0_i32_1 = arith.constant 0 : i32
    return %c0_i32, %c0_i32_0 : i32, i32
  }
  func.func @transform_5(%arg0: i32) -> (i32, i32) {
    %c0_i32 = arith.constant 0 : i32
    %c0_i32_0 = arith.constant 0 : i32
    %c0_i32_1 = arith.constant 0 : i32
    return %c0_i32, %c0_i32_0 : i32, i32
  }
  func.func @transform_6(%arg0: i32) -> (i32, i32) {
    %c0_i32 = arith.constant 0 : i32
    %c0_i32_0 = arith.constant 0 : i32
    %c0_i32_1 = arith.constant 0 : i32
    return %c0_i32, %c0_i32_0 : i32, i32
  }
  func.func @transform_7(%arg0: i32) -> (i32, i32) {
    %c0_i32 = arith.constant 0 : i32
    %c0_i32_0 = arith.constant 0 : i32
    return %arg0, %c0_i32 : i32, i32
  }
}

</mosaic_0001>

<bundles_post_ra>
// kernel: tpu_custom_call.1
= control target key start
LH: loop header
LB: loop body
LE: loop exit
PB: predicated region body
PF: predicated region fallthrough
CT: control target
= control target key end

     0   :  { %12 = vsyncpa [#allocation3], 0  ;;  %s441_s0 = inlined_call_operand.vmem [shape: bf16[8,24], index: 0, kind: input, shape index: {}]   ;;  %s442_s1 = inlined_call_operand.hbm [shape: bf16[24,32], index: 1, kind: input, shape index: {}]   ;;  %s443_s2 = inlined_call_operand.vmem [shape: f32[1,32], index: 2, kind: input, shape index: {}]   ;;  %s444_s3 = inlined_call_operand.vmem [shape: bf16[32,32], index: 3, kind: input, shape index: {}]   ;;  %s445_s4 = inlined_call_operand.vmem [shape: f32[1,32], index: 4, kind: input, shape index: {}]   ;;  %s446_s5 = inlined_call_operand.vmem [shape: bf16[32,8], index: 5, kind: input, shape index: {}]   ;;  %s447_s6 = inlined_call_operand.vmem [shape: f32[1,8], index: 6, kind: input, shape index: {}]   ;;  %s448_s7 = inlined_call_operand.hbm [shape: f32[8,8], index: 7, kind: output, shape index: {}]  }
   0x1   :  { %13 = vsyncpa [#allocation4], 0  ;;  %s365_s24 = smov [#allocation2]  }
   0x2   :  { %s21_s25 = sshll.u32 %s365_s24, 4  ;;  %s22_s25 = int_to_ptr.vmem [resolvable:$true] %s21_s25 }
   0x3   :  { %s329_s26 = scalar_lea.vmem %s22_s25, 192  ;;  %p334_p1 = scmp.lt.s32.totalorder %s22_s25, %s22_s25 }
   0x4   :  { %p330_p0 = scmp.ne.s32.totalorder %s22_s25, %s329_s26  ;;  %p335_p2 = scmp.lt.s32.totalorder %s329_s26, %s329_s26 }
   0x6   :  { %p336_p3 = por %p335_p2, %p334_p1 }
   0x8   :  { %p337_p4 = pnand %p336_p3, %p330_p0 }
   0xa   :  { %340 = shalt.err (!%p337_p4)
}
   0xb   :  { %s366_s27 = smov 64   ;;  %s367_s28 = smov 4  }
   0xc   :  { %27 = dma.hbm_to_vmem [thread:$0]  %s442_s1, 192, %s22_s25, [#allocation3], %s366_s27, %s366_s27, %s367_s28  }
   0xd   :  { %361 = dma.done.wait [#allocation3], 192  }
   0xe   :  { %362 = vsyncadd [#allocation3], 4294967104  ;;  %v368_v0 = vmov 0.0   ;;  %vm369_vm0 = vmmov 0   ;;  %vm66_vm1 = vcmask 1043456   ;;  %v316_v3 = vld [vmem:[#allocation2] sm:$0xff]  }
   0xf   :  { %285 = vmatprep.subr.bf16.mxu0 %v368_v0  ;;  %289 = vmatprep.mubr.msk.bf16.mxu0 %vm369_vm0, %v368_v0  ;;  %v315_v1 = vld [vmem:[#allocation2 + $0x8] ss:$0 sps:$4 sm:$0xff]   ;;  %v42_v4 = vld [vmem:[%s441_s0] sm:$0xf]  ;;  %vm62_vm2 = vcmask 195584   ;;  %vm135_vm3 = vcmask 261120  }
  0x10   :  { %293 = vmatprep.subr.bf16.mxu1 %v368_v0  ;;  %297 = vmatprep.mubr.msk.bf16.mxu1 %vm369_vm0, %v368_v0  ;;  %v68_v2 = vsel %vm66_vm1, %v315_v1, 0  ;;  %v317_v5 = vld [vmem:[%s444_s3 + $0x8] sm:$0xff]   ;;  %v318_v6 = vld [vmem:[%s444_s3] sm:$0xff]   ;;  %s370_s20 = smov [#allocation5]   ;;  %vm247_vm4 = vcmask 64512  }
  0x11   :  { %286 = vmatpush3.bf16.msra.mxu0 %v68_v2  ;;  %294 = vmatpush3.bf16.msra.mxu1 %v317_v5  ;;  %v319_v7 = vld [vmem:[%s446_s5 + $0x8] sm:$0xff]   ;;  %v264_v8 = vld [vmem:[%s443_s2] ss:$0 sm:$0xff]  ;;  %s255_s21 = sshll.u32 %s370_s20, 4  ;;  %s256_s21 = int_to_ptr.vmem [resolvable:$true] %s255_s21 }
  0x12   :  { %287 = vmatprep.subr.bf16.mxu0 %v368_v0  ;;  %295 = vmatprep.subr.bf16.mxu1 %v368_v0  ;;  %v320_v16 = vld [vmem:[%s446_s5] sm:$0xff]   ;;  %p346_p6 = scmp.lt.s32.totalorder %s256_s21, %s256_s21 }
  0x13   :  { %v268_v17 = vld [vmem:[%s445_s4] ss:$0 sm:$0xff]  ;;  %s341_s4 = scalar_lea.vmem %s256_s21, 128 }
  0x14   :  { %v272_v25 = vld [vmem:[%s447_s6] ss:$0 sm:$0xff]  ;;  %p342_p5 = scmp.ne.s32.totalorder %s256_s21, %s341_s4  ;;  %p347_p7 = scmp.lt.s32.totalorder %s341_s4, %s341_s4 }
  0x15   :  { %288 = vmatpush3.bf16.msra.mxu0 %v316_v3  ;;  %296 = vmatpush3.bf16.msra.mxu1 %v318_v6 }
  0x16   :  { %301 = vmatprep.subr.bf16.mxu0 %v368_v0  ;;  %p348_p8 = por %p347_p7, %p346_p6 }
  0x18   :  { %290 = vmatmul.mubr.msk.bf16.vlgmr.msra.gmra.mxu0 %vm62_vm2, %v42_v4  ;;  %p349_p9 = pnand %p348_p8, %p342_p5 }
  0x19   :  { %305 = vmatprep.mubr.msk.bf16.mxu0 %vm369_vm0, %v368_v0  ;;  %302 = vmatpush3.bf16.msra.mxu0 %v319_v7 }
  0x1a   :  { %303 = vmatprep.subr.bf16.mxu0 %v368_v0 }
  0x1d   :  { %304 = vmatpush3.bf16.msra.mxu0 %v320_v16 }
  0xd8   :  { %v104_v9 = vpop.f32.mrf.mxu0 }
  0xd9   :  { %v105_v10 = vadd.f32 %v264_v8, %v104_v9 }
  0xda   :  { %v291_v11 = vpop.f32.mrf.mxu0 }
  0xdb   :  { %v110_v12 = vmax.f32 %v105_v10, 0.0 }
  0xdc   :  { %v107_v13 = vpop.f32.mrf.mxu0 }
  0xdd   :  { %v111_v14 = vpack.c.bf16 %v110_v12, %v110_v12 }
  0xde   :  { %v292_v15 = vpop.f32.mrf.mxu0 }
  0xdf   :  { %298 = vmatmul.mubr.msk.bf16.vlgmr.msra.gmra.mxu1 %vm135_vm3, %v111_v14 }
 0x19f   :  { %v173_v18 = vpop.f32.mrf.mxu1 }
 0x1a0   :  { %v174_v19 = vadd.f32 %v268_v17, %v173_v18 }
 0x1a1   :  { %v299_v20 = vpop.f32.mrf.mxu1 }
 0x1a2   :  { %v179_v21 = vmax.f32 %v174_v19, 0.0 }
 0x1a3   :  { %v176_v22 = vpop.f32.mrf.mxu1 }
 0x1a4   :  { %v180_v23 = vpack.c.bf16 %v179_v21, %v179_v21 }
 0x1a5   :  { %v300_v24 = vpop.f32.mrf.mxu1 }
 0x1a6   :  { %306 = vmatmul.mubr.msk.bf16.vlgmr.msra.gmra.mxu0 %vm135_vm3, %v180_v23 }
 0x266   :  { %v241_v26 = vpop.f32.mrf.mxu0 }
 0x267   :  { %v242_v27 = vadd.f32 %v272_v25, %v241_v26 }
 0x268   :  { %v307_v28 = vpop.f32.mrf.mxu0 }
 0x269   :  { %248 = vst.msk [vmem:[#allocation5] sm:$0xff] %vm247_vm4, %v242_v27 }
 0x26a   :  { %v244_v29 = vpop.f32.mrf.mxu0 }
 0x26b   :  { %352 = shalt.err (!%p349_p9)
}
 0x26c   :  { %258 = dma.vmem_to_hbm [thread:$0]  %s256_s21, 128, %s448_s7, [#allocation4]   ;;  %v308_v30 = vpop.f32.mrf.mxu0 }
 0x26d   :  { %363 = dma.done.wait [#allocation4], 128  }
 0x26e   :  { %364 = vsyncadd [#allocation4], 4294967168 }
 0x26f   :  { %262 = vsyncpa [#allocation3], 1 }
 0x270   :  { %263 = vsyncpa [#allocation4], 1 }

</bundles_post_ra>
